<compile_context>
chip_gen: v7x
topology: tpu7x:2x2x1
jax: 0.10.0
libtpu: 0.0.40
codegen_flags: <defaults>
</compile_context>

<pallas_src>
import functools
import math

import jax
import jax.numpy as jnp
from jax.experimental import pallas as pl
from jax.experimental.pallas import tpu as pltpu


# ----------------------------------------------------------------------------
# Fused forward kernel: per grid step, process B_tile batches entirely in VMEM.
# ----------------------------------------------------------------------------
def _fused_attention_kernel(img_ref, q_ref, wkv_ref, bkv_ref, hsel_ref,
                            wo_ref, bo_ref, o_ref, *, n_heads, b_tile):
    hq, E = q_ref.shape                       # hq = n_heads * L_txt
    l_txt = hq // n_heads
    rows = img_ref.shape[0]
    l_img = rows // b_tile

    # --- K/V projection (image_proj folded in): one big MXU matmul -----------
    kv = jnp.dot(img_ref[...], wkv_ref[...],
                 preferred_element_type=jnp.float32) + bkv_ref[...]
    k = kv[:, :E].reshape(b_tile, l_img, E)   # layout-preserving leading-dim split
    v = kv[:, E:].reshape(b_tile, l_img, E)

    # --- scores for all heads & batches in one batched contraction -----------
    # q row (h*L_txt + t) is q[t] masked to head h's columns, so contracting the
    # full E against K rows yields exactly head h's (pre-scaled) scores.
    qb = jnp.broadcast_to(q_ref[...][None], (b_tile, hq, E))
    s = jnp.einsum('bqe,bke->bqk', qb, k,
                   preferred_element_type=jnp.float32)      # (b_tile, H*L_txt, L_img)

    # --- single softmax chain over the whole slab -----------------------------
    m = jnp.max(s, axis=-1, keepdims=True)
    p = jnp.exp(s - m)
    denom = jnp.sum(p, axis=-1, keepdims=True)

    o_all = jnp.einsum('bqk,bke->bqe', p, v,
                       preferred_element_type=jnp.float32)  # (b_tile, H*L_txt, E)
    o_all = o_all * pl.reciprocal(denom, approx=True)       # post-PV normalize (EUP)

    # --- head merge: keep head h's E-slice from row block h, sum over h -------
    o_masked = o_all * hsel_ref[...][None]                  # one full-width multiply
    o_merged = o_masked[:, 0:l_txt, :]
    for h in range(1, n_heads):                 # H-1 sublane-aligned full-width adds
        o_merged = o_merged + o_masked[:, h * l_txt:(h + 1) * l_txt, :]

    # --- output projection on a flat (B_tile*L_txt, E) row slab ---------------
    o2 = o_merged.reshape(b_tile * l_txt, E)
    out = jnp.dot(o2, wo_ref[...], preferred_element_type=jnp.float32) + bo_ref[...]
    o_ref[...] = out.astype(o_ref.dtype)


def _pick_b_tile(B, l_img, target_rows=256):
    """Largest divisor of B whose stacked KV matmul has ~target_rows rows."""
    cap = max(1, target_rows // max(l_img, 1))
    bt = min(B, cap)
    while B % bt:
        bt -= 1
    return bt


# ----------------------------------------------------------------------------
# Module forward: parameter-only folding in plain JAX, one fused Pallas call.
# ----------------------------------------------------------------------------
def attention_forward(params, image_features, text_features, n_heads, b_tile=None):
    B, L_img, Cimg = image_features.shape
    L_txt, E = text_features.shape
    assert E % n_heads == 0
    D = E // n_heads
    scale = 1.0 / math.sqrt(D)

    # -- parameter / Q preprocessing (O(params + L_txt*E), grid-invariant) -----
    Wq, Wk, Wv = jnp.split(params["in_proj_w"], 3, axis=0)      # each (E, E)
    bq, bk, bv = jnp.split(params["in_proj_b"], 3)              # each (E,)

    # scaled Q projection hoisted out of the kernel (identical for every batch)
    q = text_features @ (Wq.T * scale) + bq * scale             # (L_txt, E)
    # head-selection mask: row block h keeps only head h's E-columns
    row_head = (jnp.arange(n_heads * L_txt) // L_txt)[:, None]
    col_head = (jnp.arange(E) // D)[None, :]
    head_sel = (row_head == col_head).astype(jnp.float32)       # (H*L_txt, E)
    q_stack = jnp.tile(q, (n_heads, 1)) * head_sel               # (H*L_txt, E)

    # fold image_proj (y = x @ Wimg^T + bimg) into the K/V projections
    w_k = params["img_w"].T @ Wk.T                               # (Cimg, E)
    b_k = params["img_b"] @ Wk.T + bk
    w_v = params["img_w"].T @ Wv.T                               # (Cimg, E)
    b_v = params["img_b"] @ Wv.T + bv
    w_kv = jnp.concatenate([w_k, w_v], axis=1)                   # (Cimg, 2E)
    b_kv = jnp.concatenate([b_k, b_v]).reshape(1, 2 * E)
    w_o = params["out_w"].T                                      # (E, E)
    b_o = params["out_b"].reshape(1, E)

    if b_tile is None:
        b_tile = _pick_b_tile(B, L_img)
    n_blocks = B // b_tile
    # NOTE(v7x): for large B, n_blocks >= 2 lets the "parallel" axis shard
    # across both TensorCores; per-step VMEM here is <1 MiB so 64 MiB is ample.

    img_rows = image_features.reshape(B * L_img, Cimg)           # row-slab view in HBM

    kernel = functools.partial(_fused_attention_kernel,
                               n_heads=n_heads, b_tile=b_tile)
    out2d = pl.pallas_call(
        kernel,
        out_shape=jax.ShapeDtypeStruct((B * L_txt, E), image_features.dtype),
        grid=(n_blocks,),
        in_specs=[
            pl.BlockSpec((b_tile * L_img, Cimg), lambda i: (i, 0)),   # image row slab
            pl.BlockSpec((n_heads * L_txt, E), lambda i: (0, 0)),     # head-stacked Q
            pl.BlockSpec((Cimg, 2 * E), lambda i: (0, 0)),            # folded K|V weights
            pl.BlockSpec((1, 2 * E), lambda i: (0, 0)),               # folded K|V bias
            pl.BlockSpec((n_heads * L_txt, E), lambda i: (0, 0)),     # head-select mask
            pl.BlockSpec((E, E), lambda i: (0, 0)),                   # out-proj weight
            pl.BlockSpec((1, E), lambda i: (0, 0)),                   # out-proj bias
        ],
        out_specs=pl.BlockSpec((b_tile * L_txt, E), lambda i: (i, 0)),
        compiler_params=pltpu.CompilerParams(
            dimension_semantics=("parallel",),
        ),
    )(img_rows, q_stack, w_kv, b_kv, head_sel, w_o, b_o)
    return out2d.reshape(B, L_txt, E)


# ----------------------------------------------------------------------------
# Pure-JAX reference (mirrors PyTorch nn.MultiheadAttention semantics)
# ----------------------------------------------------------------------------
def reference_forward(params, image_features, text_features, n_heads):
    B = image_features.shape[0]
    L_txt, E = text_features.shape
    D = E // n_heads
    img = image_features @ params["img_w"].T + params["img_b"]
    txt = jnp.broadcast_to(text_features[None], (B, L_txt, E))
    Wq, Wk, Wv = jnp.split(params["in_proj_w"], 3, axis=0)
    bq, bk, bv = jnp.split(params["in_proj_b"], 3)
    q = (txt @ Wq.T + bq).reshape(B, L_txt, n_heads, D).transpose(0, 2, 1, 3)
    k = (img @ Wk.T + bk).reshape(B, -1, n_heads, D).transpose(0, 2, 1, 3)
    v = (img @ Wv.T + bv).reshape(B, -1, n_heads, D).transpose(0, 2, 1, 3)
    s = jnp.einsum("bhqd,bhkd->bhqk", q, k) / math.sqrt(D)
    p = jax.nn.softmax(s, axis=-1)
    o = jnp.einsum("bhqk,bhkd->bhqd", p, v).transpose(0, 2, 1, 3).reshape(B, L_txt, E)
    return o @ params["out_w"].T + params["out_b"]


# ----------------------------------------------------------------------------
# Deterministic parameter init (shapes follow the PyTorch __init__)
# ----------------------------------------------------------------------------
def init_params(key, image_c, text_c):
    ks = jax.random.split(key, 6)
    return {
        "img_w": 0.05 * jax.random.normal(ks[0], (text_c, image_c), jnp.float32),
        "img_b": 0.05 * jax.random.normal(ks[1], (text_c,), jnp.float32),
        "in_proj_w": 0.05 * jax.random.normal(ks[2], (3 * text_c, text_c), jnp.float32),
        "in_proj_b": 0.05 * jax.random.normal(ks[3], (3 * text_c,), jnp.float32),
        "out_w": 0.05 * jax.random.normal(ks[4], (text_c, text_c), jnp.float32),
        "out_b": 0.05 * jax.random.normal(ks[5], (text_c,), jnp.float32),
    }


if __name__ == "__main__":
    B, L_img, image_c = 2, 16, 48
    L_txt, text_c, n_heads = 8, 64, 8

    key = jax.random.PRNGKey(0)
    k_param, k_img, k_txt = jax.random.split(key, 3)
    params = init_params(k_param, image_c, text_c)
    image_features = jax.random.normal(k_img, (B, L_img, image_c), jnp.float32)
    text_features = jax.random.normal(k_txt, (L_txt, text_c), jnp.float32)

    fwd = jax.jit(functools.partial(attention_forward, n_heads=n_heads))
    out = fwd(params, image_features, text_features)
    out = jax.block_until_ready(out)

    ref = reference_forward(params, image_features, text_features, n_heads)
    assert out.shape == (B, L_txt, text_c)
    # tolerance accommodates weight-folding reassociation + approx reciprocal
    assert jnp.allclose(out, ref, atol=1e-3, rtol=1e-3), "mismatch vs reference"

    print("KERNEL_OK")
</pallas_src>

<mosaic_0001>
module attributes {stable_mosaic.version = 11 : i64} {
  func.func @_fused_attention_kernel(%arg0: i32, %arg1: memref<32x48xf32, #tpu.memory_space<vmem>>, %arg2: memref<64x64xf32, #tpu.memory_space<vmem>>, %arg3: memref<48x128xf32, #tpu.memory_space<vmem>>, %arg4: memref<1x128xf32, #tpu.memory_space<vmem>>, %arg5: memref<64x64xf32, #tpu.memory_space<vmem>>, %arg6: memref<64x64xf32, #tpu.memory_space<vmem>>, %arg7: memref<1x64xf32, #tpu.memory_space<vmem>>, %arg8: memref<16x64xf32, #tpu.memory_space<vmem>>) attributes {dimension_semantics = [#tpu.dimension_semantics<parallel>], iteration_bounds = array<i64: 1>, scalar_prefetch = 0 : i64, scratch_operands = 0 : i64, tpu.core_type = #tpu.core_type<tc>, window_params = [{transform_indices = @transform_0, window_bounds = array<i64: 32, 48>}, {pipeline_mode = #tpu.pipeline_mode<synchronous>, transform_indices = @transform_1, window_bounds = array<i64: 64, 64>}, {pipeline_mode = #tpu.pipeline_mode<synchronous>, transform_indices = @transform_2, window_bounds = array<i64: 48, 128>}, {pipeline_mode = #tpu.pipeline_mode<synchronous>, transform_indices = @transform_3, window_bounds = array<i64: 1, 128>}, {pipeline_mode = #tpu.pipeline_mode<synchronous>, transform_indices = @transform_4, window_bounds = array<i64: 64, 64>}, {pipeline_mode = #tpu.pipeline_mode<synchronous>, transform_indices = @transform_5, window_bounds = array<i64: 64, 64>}, {pipeline_mode = #tpu.pipeline_mode<synchronous>, transform_indices = @transform_6, window_bounds = array<i64: 1, 64>}, {transform_indices = @transform_7, window_bounds = array<i64: 16, 64>}]} {
    %c0 = arith.constant 0 : index
    %c0_0 = arith.constant 0 : index
    %0 = vector.load %arg1[%c0, %c0_0] : memref<32x48xf32, #tpu.memory_space<vmem>>, vector<32x48xf32>
    %c0_1 = arith.constant 0 : index
    %c0_2 = arith.constant 0 : index
    %1 = vector.load %arg3[%c0_1, %c0_2] : memref<48x128xf32, #tpu.memory_space<vmem>>, vector<48x128xf32>
    %cst = arith.constant dense<0.000000e+00> : vector<32x128xf32>
    %2 = tpu.matmul %0, %1, %cst {dimension_numbers = #tpu.dot_dimension_numbers<[1], [0], [0], [1], [0, 0, 1, 1], [], []>} : vector<32x48xf32>, vector<48x128xf32>, vector<32x128xf32> -> vector<32x128xf32>
    %c0_3 = arith.constant 0 : index
    %c0_4 = arith.constant 0 : index
    %3 = vector.load %arg4[%c0_3, %c0_4] : memref<1x128xf32, #tpu.memory_space<vmem>>, vector<1x128xf32>
    %4 = vector.broadcast %3 : vector<1x128xf32> to vector<32x128xf32>
    %5 = arith.addf %2, %4 : vector<32x128xf32>
    %6 = vector.extract_strided_slice %5 {offsets = [0, 0], sizes = [32, 64], strides = [1, 1]} : vector<32x128xf32> to vector<32x64xf32>
    %7 = vector.shape_cast %6 : vector<32x64xf32> to vector<2x16x64xf32>
    %8 = vector.extract_strided_slice %5 {offsets = [0, 64], sizes = [32, 64], strides = [1, 1]} : vector<32x128xf32> to vector<32x64xf32>
    %9 = vector.shape_cast %8 : vector<32x64xf32> to vector<2x16x64xf32>
    %c0_5 = arith.constant 0 : index
    %c0_6 = arith.constant 0 : index
    %10 = vector.load %arg2[%c0_5, %c0_6] : memref<64x64xf32, #tpu.memory_space<vmem>>, vector<64x64xf32>
    %11 = vector.shape_cast %10 : vector<64x64xf32> to vector<1x64x64xf32>
    %12 = vector.shape_cast %11 : vector<1x64x64xf32> to vector<1x64x64xf32>
    %13 = vector.broadcast %12 : vector<1x64x64xf32> to vector<2x64x64xf32>
    "tpu.trace_start"() <{level = 10 : i32, message = "bqe,bke->bqk"}> : () -> ()
    %cst_7 = arith.constant dense<0.000000e+00> : vector<2x64x16xf32>
    %14 = tpu.matmul %13, %7, %cst_7 {dimension_numbers = #tpu.dot_dimension_numbers<[2], [2], [1], [1], [0, 0, 0, 1, 1, 1], [0], [0]>} : vector<2x64x64xf32>, vector<2x16x64xf32>, vector<2x64x16xf32> -> vector<2x64x16xf32>
    "tpu.trace_stop"() : () -> ()
    %cst_8 = arith.constant dense<0xFF800000> : vector<2x64xf32>
    %15 = vector.multi_reduction <maximumf>, %14, %cst_8 [2] : vector<2x64x16xf32> to vector<2x64xf32>
    %16 = vector.shape_cast %15 : vector<2x64xf32> to vector<2x64x1xf32>
    %17 = vector.broadcast %16 : vector<2x64x1xf32> to vector<2x64x16xf32>
    %18 = arith.subf %14, %17 : vector<2x64x16xf32>
    %19 = math.exp %18 : vector<2x64x16xf32>
    %cst_9 = arith.constant dense<0.000000e+00> : vector<2x64xf32>
    %20 = vector.multi_reduction <add>, %19, %cst_9 [2] : vector<2x64x16xf32> to vector<2x64xf32>
    %21 = vector.shape_cast %20 : vector<2x64xf32> to vector<2x64x1xf32>
    "tpu.trace_start"() <{level = 10 : i32, message = "bqk,bke->bqe"}> : () -> ()
    %cst_10 = arith.constant dense<0.000000e+00> : vector<2x64x64xf32>
    %22 = tpu.matmul %19, %9, %cst_10 {dimension_numbers = #tpu.dot_dimension_numbers<[2], [1], [1], [2], [0, 0, 0, 1, 1, 2], [0], [0]>} : vector<2x64x16xf32>, vector<2x16x64xf32>, vector<2x64x64xf32> -> vector<2x64x64xf32>
    "tpu.trace_stop"() : () -> ()
    %23 = tpu.reciprocal %21 {approx = true} : vector<2x64x1xf32> -> vector<2x64x1xf32>
    %24 = vector.broadcast %23 : vector<2x64x1xf32> to vector<2x64x64xf32>
    %25 = arith.mulf %22, %24 : vector<2x64x64xf32>
    %c0_11 = arith.constant 0 : index
    %c0_12 = arith.constant 0 : index
    %26 = vector.load %arg5[%c0_11, %c0_12] : memref<64x64xf32, #tpu.memory_space<vmem>>, vector<64x64xf32>
    %27 = vector.shape_cast %26 : vector<64x64xf32> to vector<1x64x64xf32>
    %28 = vector.broadcast %27 : vector<1x64x64xf32> to vector<2x64x64xf32>
    %29 = arith.mulf %25, %28 : vector<2x64x64xf32>
    %30 = vector.extract_strided_slice %29 {offsets = [0, 0, 0], sizes = [2, 8, 64], strides = [1, 1, 1]} : vector<2x64x64xf32> to vector<2x8x64xf32>
    %31 = vector.extract_strided_slice %29 {offsets = [0, 8, 0], sizes = [2, 8, 64], strides = [1, 1, 1]} : vector<2x64x64xf32> to vector<2x8x64xf32>
    %32 = arith.addf %30, %31 : vector<2x8x64xf32>
    %33 = vector.extract_strided_slice %29 {offsets = [0, 16, 0], sizes = [2, 8, 64], strides = [1, 1, 1]} : vector<2x64x64xf32> to vector<2x8x64xf32>
    %34 = arith.addf %32, %33 : vector<2x8x64xf32>
    %35 = vector.extract_strided_slice %29 {offsets = [0, 24, 0], sizes = [2, 8, 64], strides = [1, 1, 1]} : vector<2x64x64xf32> to vector<2x8x64xf32>
    %36 = arith.addf %34, %35 : vector<2x8x64xf32>
    %37 = vector.extract_strided_slice %29 {offsets = [0, 32, 0], sizes = [2, 8, 64], strides = [1, 1, 1]} : vector<2x64x64xf32> to vector<2x8x64xf32>
    %38 = arith.addf %36, %37 : vector<2x8x64xf32>
    %39 = vector.extract_strided_slice %29 {offsets = [0, 40, 0], sizes = [2, 8, 64], strides = [1, 1, 1]} : vector<2x64x64xf32> to vector<2x8x64xf32>
    %40 = arith.addf %38, %39 : vector<2x8x64xf32>
    %41 = vector.extract_strided_slice %29 {offsets = [0, 48, 0], sizes = [2, 8, 64], strides = [1, 1, 1]} : vector<2x64x64xf32> to vector<2x8x64xf32>
    %42 = arith.addf %40, %41 : vector<2x8x64xf32>
    %43 = vector.extract_strided_slice %29 {offsets = [0, 56, 0], sizes = [2, 8, 64], strides = [1, 1, 1]} : vector<2x64x64xf32> to vector<2x8x64xf32>
    %44 = arith.addf %42, %43 : vector<2x8x64xf32>
    %45 = vector.shape_cast %44 : vector<2x8x64xf32> to vector<16x64xf32>
    %c0_13 = arith.constant 0 : index
    %c0_14 = arith.constant 0 : index
    %46 = vector.load %arg6[%c0_13, %c0_14] : memref<64x64xf32, #tpu.memory_space<vmem>>, vector<64x64xf32>
    %cst_15 = arith.constant dense<0.000000e+00> : vector<16x64xf32>
    %47 = tpu.matmul %45, %46, %cst_15 {dimension_numbers = #tpu.dot_dimension_numbers<[1], [0], [0], [1], [0, 0, 1, 1], [], []>} : vector<16x64xf32>, vector<64x64xf32>, vector<16x64xf32> -> vector<16x64xf32>
    %c0_16 = arith.constant 0 : index
    %c0_17 = arith.constant 0 : index
    %48 = vector.load %arg7[%c0_16, %c0_17] : memref<1x64xf32, #tpu.memory_space<vmem>>, vector<1x64xf32>
    %49 = vector.broadcast %48 : vector<1x64xf32> to vector<16x64xf32>
    %50 = arith.addf %47, %49 : vector<16x64xf32>
    %c0_18 = arith.constant 0 : index
    %c0_19 = arith.constant 0 : index
    %51 = vector.load %arg8[%c0_18, %c0_19] : memref<16x64xf32, #tpu.memory_space<vmem>>, vector<16x64xf32>
    tpu.vector_store %arg8[%c0_18, %c0_19], %50 {strides = array<i32>} : memref<16x64xf32, #tpu.memory_space<vmem>>, vector<16x64xf32>,
    return
  }
  func.func @transform_0(%arg0: i32) -> (i32, i32) {
    %c0_i32 = arith.constant 0 : i32
    %c0_i32_0 = arith.constant 0 : i32
    return %arg0, %c0_i32 : i32, i32
  }
  func.func @transform_1(%arg0: i32) -> (i32, i32) {
    %c0_i32 = arith.constant 0 : i32
    %c0_i32_0 = arith.constant 0 : i32
    %c0_i32_1 = arith.constant 0 : i32
    return %c0_i32, %c0_i32_0 : i32, i32
  }
  func.func @transform_2(%arg0: i32) -> (i32, i32) {
    %c0_i32 = arith.constant 0 : i32
    %c0_i32_0 = arith.constant 0 : i32
    %c0_i32_1 = arith.constant 0 : i32
    return %c0_i32, %c0_i32_0 : i32, i32
  }
  func.func @transform_3(%arg0: i32) -> (i32, i32) {
    %c0_i32 = arith.constant 0 : i32
    %c0_i32_0 = arith.constant 0 : i32
    %c0_i32_1 = arith.constant 0 : i32
    return %c0_i32, %c0_i32_0 : i32, i32
  }
  func.func @transform_4(%arg0: i32) -> (i32, i32) {
    %c0_i32 = arith.constant 0 : i32
    %c0_i32_0 = arith.constant 0 : i32
    %c0_i32_1 = arith.constant 0 : i32
    return %c0_i32, %c0_i32_0 : i32, i32
  }
  func.func @transform_5(%arg0: i32) -> (i32, i32) {
    %c0_i32 = arith.constant 0 : i32
    %c0_i32_0 = arith.constant 0 : i32
    %c0_i32_1 = arith.constant 0 : i32
    return %c0_i32, %c0_i32_0 : i32, i32
  }
  func.func @transform_6(%arg0: i32) -> (i32, i32) {
    %c0_i32 = arith.constant 0 : i32
    %c0_i32_0 = arith.constant 0 : i32
    %c0_i32_1 = arith.constant 0 : i32
    return %c0_i32, %c0_i32_0 : i32, i32
  }
  func.func @transform_7(%arg0: i32) -> (i32, i32) {
    %c0_i32 = arith.constant 0 : i32
    %c0_i32_0 = arith.constant 0 : i32
    return %arg0, %c0_i32 : i32, i32
  }
}

</mosaic_0001>

<bundles_post_ra>
// kernel: attention_forward.1
= control target key start
LH: loop header
LB: loop body
LE: loop exit
PB: predicated region body
PF: predicated region fallthrough
CT: control target
= control target key end

     0   :  { %vm44_vm0 = vcmask 392192   ;;  %s1689_s0 = inlined_call_operand.vmem [shape: f32[32,48], index: 0, kind: input, shape index: {}]   ;;  %s1690_s1 = inlined_call_operand.vmem [shape: f32[64,64], index: 1, kind: input, shape index: {}]   ;;  %s1691_s2 = inlined_call_operand.vmem [shape: f32[48,128], index: 2, kind: input, shape index: {}]   ;;  %s1692_s3 = inlined_call_operand.vmem [shape: f32[1,128], index: 3, kind: input, shape index: {}]   ;;  %s1693_s4 = inlined_call_operand.vmem [shape: f32[64,64], index: 4, kind: input, shape index: {}]   ;;  %s1694_s5 = inlined_call_operand.vmem [shape: f32[64,64], index: 5, kind: input, shape index: {}]   ;;  %s1695_s6 = inlined_call_operand.vmem [shape: f32[1,64], index: 6, kind: input, shape index: {}]   ;;  %s1696_s7 = inlined_call_operand.hbm [shape: f32[16,64], index: 7, kind: output, shape index: {}]  }
   0x1   :  { %v31_v0 = vld [vmem:[%s1691_s2] sm:$0xff]  ;;  %v32_v1 = vld [vmem:[%s1691_s2 + $0x8] sm:$0xff]  ;;  %v33_v2 = vld [vmem:[%s1691_s2 + $0x10] sm:$0xff] }
   0x2   :  { %v1201_v3 = vpack.c.bf16 %v32_v1, %v31_v0  ;;  %v34_v4 = vld [vmem:[%s1691_s2 + $0x18] sm:$0xff]  ;;  %v35_v6 = vld [vmem:[%s1691_s2 + $0x20] sm:$0xff]  ;;  %v36_v7 = vld [vmem:[%s1691_s2 + $0x28] sm:$0xff] }
   0x3   :  { %v1205_v5 = vpack.c.bf16 %v34_v4, %v33_v2  ;;  %v27_v8 = vld [vmem:[%s1689_s0] sm:$0xff] }
   0x4   :  { %1202 = vmatprep.subr.bf16.mxu0 %v1201_v3  ;;  %1112 = vmatprep.mubr.msk.f32.mxu0 %vm44_vm0, %v27_v8 }
   0x5   :  { %12 = vsyncpa [#allocation3], 0  ;;  %1204 = vmatpush3.bf16.msra.mxu0 %v1201_v3  ;;  %v1209_v9 = vpack.c.bf16 %v36_v7, %v35_v6  ;;  %v28_v10 = vld [vmem:[%s1689_s0 + $0x8] sm:$0xff]  ;;  %v29_v11 = vld [vmem:[%s1689_s0 + $0x10] sm:$0xff]  ;;  %vm150_vm1 = vcmask 523264   ;;  %vm397_vm3 = vcmask 130048  }
   0x6   :  { %1206 = vmatprep.subr.bf16.mxu0 %v1205_v5  ;;  %v30_v12 = vld [vmem:[%s1689_s0 + $0x18] sm:$0xff]  ;;  %v142_v13 = vld [vmem:[%s1690_s1] sm:$0xff]  ;;  %vm1445_vm2 = vmpackc.low %vm150_vm1, %vm150_vm1  ;;  %s1354_s2 = smov [#allocation2]  }
   0x7   :  { %1122 = vmatprep.mubr.msk.f32.mxu1 %vm150_vm1, %v142_v13  ;;  %v996_v14 = vld [vmem:[%s1692_s3] ss:$0 sm:$0xff]  ;;  %v143_v28 = vld [vmem:[%s1690_s1 + $0x8] sm:$0xff]  ;;  %v144_v29 = vld [vmem:[%s1690_s1 + $0x10] sm:$0xff]  ;;  %s985_s18 = sshll.u32 %s1354_s2, 4  ;;  %s986_s18 = int_to_ptr.vmem [resolvable:$true] %s985_s18 }
   0x8   :  { %v145_v30 = vld [vmem:[%s1690_s1 + $0x18] sm:$0xff]  ;;  %v146_v31 = vld [vmem:[%s1690_s1 + $0x20] sm:$0xff]  ;;  %v147_v32 = vld [vmem:[%s1690_s1 + $0x28] sm:$0xff]  ;;  %s1329_s19 = scalar_lea.vmem %s986_s18, 256  ;;  %p1334_p1 = scmp.lt.s32.totalorder %s986_s18, %s986_s18 }
   0x9   :  { %1208 = vmatpush3.bf16.msra.mxu0 %v1205_v5  ;;  %v148_v33 = vld [vmem:[%s1690_s1 + $0x30] sm:$0xff]  ;;  %v149_v34 = vld [vmem:[%s1690_s1 + $0x38] sm:$0xff]  ;;  %s1353_s1 = smov 64   ;;  %p1330_p0 = scmp.ne.s32.totalorder %s986_s18, %s1329_s19 }
   0xa   :  { %1210 = vmatprep.subr.bf16.mxu0 %v1209_v9  ;;  %p1335_p2 = scmp.lt.s32.totalorder %s1329_s19, %s1329_s19 }
   0xc   :  { %p1336_p3 = por %p1335_p2, %p1334_p1 }
   0xd   :  { %1212 = vmatpush3.bf16.msra.mxu0 %v1209_v9 }
   0xe   :  { %p1337_p4 = pnand %p1336_p3, %p1330_p0 }
  0x10   :  { %1113 = vmatmul.mubr.msk.f32.vlgmr.msra.gmra.mrb[0].mxu0 %vm44_vm0, %v28_v10 }
  0x11   :  { %1115 = vmatprep.mubr.msk.f32.mxu0 %vm44_vm0, %v29_v11 }
  0x14   :  { %1116 = vmatmul.mubr.msk.f32.gmra.mrb[2].mxu0 %vm44_vm0, %v30_v12 }
  0x15   :  { %1138 = vmatprep.mubr.msk.f32.mxu0 %vm150_vm1, %v142_v13 }
  0xe3   :  { %v1114_v15 = vpop.f32.mrb[0].mxu0 }
  0xe4   :  { %v1439_v16 = vadd.f32 %v1114_v15, %v996_v14  ;;  %v123_v17 = vpop.f32.mrb[1].mxu0 }
  0xe5   :  { %v1441_v18 = vadd.f32 %v996_v14, %v123_v17 }
  0xe7   :  { %v1255_v20 = vpack.i.bf16 %v1439_v16, %v1441_v18  ;;  %v1117_v21 = vpop.f32.mrb[2].mxu0  ;;  %v1213_v22 = vpack.c.bf16 %v1439_v16, %v1441_v18 }
  0xe8   :  { %v1453_v23 = vadd.f32 %v1117_v21, %v996_v14  ;;  %v133_v24 = vpop.f32.mrb[3].mxu0 }
  0xe9   :  { %v1455_v25 = vadd.f32 %v996_v14, %v133_v24  ;;  %1215 = vmatprep.subr.msk.bf16.mxu1 %vm1445_vm2, %v1213_v22 }
  0xea   :  { %1218 = vmatpush3.bf16.xpose.msk.msra.mxu1 %vm1445_vm2, %v1213_v22 }
  0xeb   :  { %v1260_v26 = vpack.i.bf16 %v1453_v23, %v1455_v25  ;;  %v1219_v27 = vpack.c.bf16 %v1453_v23, %v1455_v25 }
  0xed   :  { %1221 = vmatprep.subr.msk.bf16.mxu0 %vm1445_vm2, %v1219_v27  ;;  %1249 = vmatprep.subr.msk.bf16.mxu1 %vm1445_vm2, %v1219_v27 }
  0xee   :  { %1224 = vmatpush3.bf16.xpose.msk.msra.mxu0 %vm1445_vm2, %v1219_v27 }
  0xf1   :  { %1123 = vmatmul.mubr.msk.f32.vlgmr.msra.gmra.mrb[0].mxu1 %vm150_vm1, %v143_v28 }
  0xf2   :  { %1250 = vmatpush3.bf16.xpose.msk.msra.mxu1 %vm1445_vm2, %v1219_v27  ;;  %1125 = vmatprep.mubr.msk.f32.mxu1 %vm150_vm1, %v144_v29 }
  0xf5   :  { %1139 = vmatmul.mubr.msk.f32.vlgmr.msra.gmra.mrb[4].mxu0 %vm150_vm1, %v143_v28  ;;  %1126 = vmatmul.mubr.msk.f32.gmra.mrb[2].mxu1 %vm150_vm1, %v145_v30 }
  0xf6   :  { %1141 = vmatprep.mubr.msk.f32.mxu0 %vm150_vm1, %v144_v29  ;;  %1128 = vmatprep.mubr.msk.f32.mxu1 %vm150_vm1, %v146_v31 }
  0xf9   :  { %1142 = vmatmul.mubr.msk.f32.gmra.mrb[6].mxu0 %vm150_vm1, %v145_v30  ;;  %1129 = vmatmul.mubr.msk.f32.gmra.mrb[4].mxu1 %vm150_vm1, %v147_v32 }
  0xfa   :  { %1144 = vmatprep.mubr.msk.f32.mxu0 %vm150_vm1, %v146_v31  ;;  %1131 = vmatprep.mubr.msk.f32.mxu1 %vm150_vm1, %v148_v33 }
  0xfd   :  { %1145 = vmatmul.mubr.msk.f32.gmra.mrb[8].mxu0 %vm150_vm1, %v147_v32  ;;  %1132 = vmatmul.mubr.msk.f32.gmra.mrb[6].mxu1 %vm150_vm1, %v149_v34 }
  0xfe   :  { %1147 = vmatprep.mubr.msk.f32.mxu1 %vm150_vm1, %v148_v33 }
 0x101   :  { %1148 = vmatmul.mubr.msk.f32.vlgmr.msra.gmra.mrb[8].mxu1 %vm150_vm1, %v149_v34 }
 0x1c4   :  { %v1124_v35 = vpop.f32.mrb[0].mxu1 }
 0x1c5   :  { %v401_v36 = vsel %vm397_vm3, %v1124_v35, -inf  ;;  %v247_v37 = vpop.f32.mrb[1].mxu1 }
 0x1c6   :  { %402 = vmax.xlane.f32.xlu0 %v401_v36  ;;  %v398_v38 = vsel %vm397_vm3, %v247_v37, -inf }
 0x1c8   :  { %v1140_v39 = vpop.f32.mrb[4].mxu0  ;;  %v1127_v40 = vpop.f32.mrb[2].mxu1 }
 0x1c9   :  { %v1510_v41 = vpop.f32.mrb[5].mxu0  ;;  %v425_v42 = vsel %vm397_vm3, %v1140_v39, -inf  ;;  %v1513_v43 = vpop.f32.mrb[3].mxu1  ;;  %v407_v44 = vsel %vm397_vm3, %v1127_v40, -inf }
 0x1ca   :  { %426 = vmax.xlane.f32.xlu1 %v425_v42  ;;  %399 = vmax.xlane.f32.xlu0 %v398_v38  ;;  %v404_v45 = vsel %vm397_vm3, %v1513_v43, -inf  ;;  %v422_v53 = vsel %vm397_vm3, %v1510_v41, -inf }
 0x1cc   :  { %v1518_v46 = vpop.f32.mrb[6].mxu0  ;;  %v1520_v47 = vpop.f32.mrb[4].mxu1 }
 0x1cd   :  { %v1522_v48 = vpop.f32.mrb[7].mxu0  ;;  %v1524_v49 = vpop.f32.mrb[5].mxu1  ;;  %v431_v58 = vsel %vm397_vm3, %v1518_v46, -inf  ;;  %v413_v61 = vsel %vm397_vm3, %v1520_v47, -inf }
 0x1ce   :  { %408 = vmax.xlane.f32.xlu1 %v407_v44  ;;  %405 = vmax.xlane.f32.xlu0 %v404_v45  ;;  %v428_v50 = vsel %vm397_vm3, %v1522_v48, -inf  ;;  %v410_v56 = vsel %vm397_vm3, %v1524_v49, -inf }
 0x1d0   :  { %v1528_v51 = vpop.f32.mrb[8].mxu0  ;;  %v1530_v52 = vpop.f32.mrb[6].mxu1 }
 0x1d1   :  { %v1534_v54 = vpop.f32.mrb[9].mxu0  ;;  %v1536_v55 = vpop.f32.mrb[7].mxu1  ;;  %v437_v63 = vsel %vm397_vm3, %v1528_v51, -inf  ;;  %v419_v1 = vsel %vm397_vm3, %v1530_v52, -inf }
 0x1d2   :  { %423 = vmax.xlane.f32.xlu1 %v422_v53  ;;  %429 = vmax.xlane.f32.xlu0 %v428_v50  ;;  %v434_v60 = vsel %vm397_vm3, %v1534_v54, -inf  ;;  %v416_v62 = vsel %vm397_vm3, %v1536_v55, -inf }
 0x1d4   :  { %v1540_v57 = vpop.f32.mrb[8].mxu1 }
 0x1d5   :  { %v1544_v59 = vpop.f32.mrb[9].mxu1  ;;  %v443_v2 = vsel %vm397_vm3, %v1540_v57, -inf }
 0x1d6   :  { %432 = vmax.xlane.f32.xlu1 %v431_v58  ;;  %411 = vmax.xlane.f32.xlu0 %v410_v56  ;;  %v440_v0 = vsel %vm397_vm3, %v1544_v59, -inf }
 0x1da   :  { %414 = vmax.xlane.f32.xlu1 %v413_v61  ;;  %435 = vmax.xlane.f32.xlu0 %v434_v60 }
 0x1de   :  { %438 = vmax.xlane.f32.xlu1 %v437_v63  ;;  %417 = vmax.xlane.f32.xlu0 %v416_v62 }
 0x1e2   :  { %420 = vmax.xlane.f32.xlu1 %v419_v1  ;;  %441 = vmax.xlane.f32.xlu0 %v440_v0 }
 0x1e6   :  { %444 = vmax.xlane.f32.xlu1 %v443_v2 }
 0x1f7   :  { %1261 = vrot.lane.b32.xlu1 %v1260_v26, %s1353_s1 }
 0x1f8   :  { %1256 = vrot.lane.b32.xlu0 %v1255_v20, %s1353_s1 }
 0x253   :  { %v403_v3 = vpop.xlane.xlu0 %402 }
 0x254   :  { %v447_v4 = vsub.f32 %v1124_v35, %v403_v3 }
 0x256   :  { %v464_v5 = vmul.f32 1.442695, %v447_v4 }
 0x257   :  { %v427_v6 = vpop.xlane.xlu1 %426  ;;  %v400_v7 = vpop.xlane.xlu0 %399 }
 0x258   :  { %1265 = vpow2.f32 %v464_v5  ;;  %v455_v8 = vsub.f32 %v1140_v39, %v427_v6  ;;  %v446_v9 = vsub.f32 %v247_v37, %v400_v7 }
 0x25a   :  { %v462_v10 = vmul.f32 1.442695, %v446_v9  ;;  %v480_v11 = vmul.f32 1.442695, %v455_v8 }
 0x25b   :  { %v409_v12 = vpop.xlane.xlu1 %408  ;;  %v406_v13 = vpop.xlane.xlu0 %405 }
 0x25c   :  { %v449_v14 = vsub.f32 %v1127_v40, %v409_v12  ;;  %1267 = vpow2.f32 %v462_v10  ;;  %v448_v17 = vsub.f32 %v1513_v43, %v406_v13 }
 0x25d   :  { %1269 = vpow2.f32 %v480_v11 }
 0x25e   :  { %v468_v15 = vmul.f32 1.442695, %v449_v14  ;;  %v466_v21 = vmul.f32 1.442695, %v448_v17 }
 0x25f   :  { %v424_v16 = vpop.xlane.xlu1 %423  ;;  %v430_v18 = vpop.xlane.xlu0 %429 }
 0x260   :  { %1271 = vpow2.f32 %v468_v15  ;;  %v454_v19 = vsub.f32 %v1510_v41, %v424_v16  ;;  %v456_v23 = vsub.f32 %v1522_v48, %v430_v18 }
 0x262   :  { %v1568_v20 = vpop.eup %1265  ;;  %v478_v22 = vmul.f32 1.442695, %v454_v19  ;;  %v482_v28 = vmul.f32 1.442695, %v456_v23 }
 0x263   :  { %v433_v24 = vpop.xlane.xlu1 %432  ;;  %v412_v25 = vpop.xlane.xlu0 %411  ;;  %v497_v26 = vsel %vm397_vm3, %v1568_v20, 0.0 }
 0x264   :  { %1273 = vpow2.f32 %v478_v22  ;;  %v457_v27 = vsub.f32 %v1518_v46, %v433_v24  ;;  %498 = vadd.xlane.f32.xlu0 %v497_v26  ;;  %v450_v31 = vsub.f32 %v1524_v49, %v412_v25 }
 0x265   :  { %1275 = vpow2.f32 %v466_v21 }
 0x266   :  { %v484_v29 = vmul.f32 1.442695, %v457_v27  ;;  %v1268_v30 = vpop.eup %1267  ;;  %v470_v40 = vmul.f32 1.442695, %v450_v31  ;;  %v882_v27 = vld [vmem:[%s1694_s5] sm:$0xff]  ;;  %v885_v31 = vld [vmem:[%s1694_s5 + $0x18] sm:$0xff] }
 0x267   :  { %v415_v32 = vpop.xlane.xlu1 %414  ;;  %v436_v33 = vpop.xlane.xlu0 %435  ;;  %1154 = vmatprep.mubr.msk.f32.mxu1 %vm397_vm3, %v1268_v30  ;;  %v494_v35 = vsel %vm397_vm3, %v1268_v30, 0.0  ;;  %v884_v30 = vld [vmem:[%s1694_s5 + $0x10] sm:$0xff] }
 0x268   :  { %1277 = vpow2.f32 %v484_v29  ;;  %v451_v34 = vsub.f32 %v1520_v47, %v415_v32  ;;  %v1578_v36 = vpop.eup %1269  ;;  %495 = vadd.xlane.f32.xlu1 %v494_v35  ;;  %v458_v39 = vsub.f32 %v1534_v54, %v436_v33  ;;  %v1237_v32 = vpack.c.bf16 %v885_v31, %v884_v30  ;;  %v886_v33 = vld [vmem:[%s1694_s5 + $0x20] sm:$0xff] }
 0x269   :  { %1279 = vpow2.f32 %v482_v28  ;;  %v521_v46 = vsel %vm397_vm3, %v1578_v36, 0.0  ;;  %v883_v28 = vld [vmem:[%s1694_s5 + $0x8] sm:$0xff] }
 0x26a   :  { %v1580_v37 = vpop.eup %1271  ;;  %v472_v38 = vmul.f32 1.442695, %v451_v34  ;;  %v486_v48 = vmul.f32 1.442695, %v458_v39  ;;  %v1233_v29 = vpack.c.bf16 %v883_v28, %v882_v27  ;;  %v887_v34 = vld [vmem:[%s1694_s5 + $0x28] sm:$0xff] }
 0x26b   :  { %v439_v41 = vpop.xlane.xlu1 %438  ;;  %v418_v42 = vpop.xlane.xlu0 %417  ;;  %v503_v43 = vsel %vm397_vm3, %v1580_v37, 0.0  ;;  %v1241_v35 = vpack.c.bf16 %v887_v34, %v886_v33 }
 0x26c   :  { %1281 = vpow2.f32 %v472_v38  ;;  %v459_v44 = vsub.f32 %v1528_v51, %v439_v41  ;;  %v452_v45 = vsub.f32 %v1536_v55, %v418_v42  ;;  %504 = vadd.xlane.f32.xlu0 %v503_v43  ;;  %522 = vadd.xlane.f32.xlu1 %v521_v46 }
 0x26d   :  { %1283 = vpow2.f32 %v470_v40 }
 0x26e   :  { %v1274_v47 = vpop.eup %1273  ;;  %v488_v49 = vmul.f32 1.442695, %v459_v44  ;;  %v474_v50 = vmul.f32 1.442695, %v452_v45 }
 0x26f   :  { %1170 = vmatprep.mubr.msk.f32.mxu0 %vm397_vm3, %v1274_v47  ;;  %v421_v53 = vpop.xlane.xlu1 %420  ;;  %v442_v54 = vpop.xlane.xlu0 %441  ;;  %v518_v56 = vsel %vm397_vm3, %v1274_v47, 0.0 }
 0x270   :  { %v1276_v58 = vpop.eup %1275  ;;  %1285 = vpow2.f32 %v488_v49  ;;  %v453_v51 = vsub.f32 %v1530_v52, %v421_v53  ;;  %v460_v55 = vsub.f32 %v1544_v59, %v442_v54  ;;  %519 = vadd.xlane.f32.xlu0 %v518_v56 }
 0x271   :  { %1287 = vpow2.f32 %v486_v48  ;;  %v500_v2 = vsel %vm397_vm3, %v1276_v58, 0.0 }
 0x272   :  { %v1278_v60 = vpop.eup %1277  ;;  %v490_v61 = vmul.f32 1.442695, %v460_v55  ;;  %1289 = vpow2.f32 %v474_v50  ;;  %v476_v62 = vmul.f32 1.442695, %v453_v51  ;;  %v845_v51 = vld [vmem:[%s1693_s4 + $0x8] sm:$0xff] }
 0x273   :  { %v445_v63 = vpop.xlane.xlu1 %444  ;;  %v1257_v0 = vpop.permute.xlu0 %1256  ;;  %v527_v1 = vsel %vm397_vm3, %v1278_v60, 0.0 }
 0x274   :  { %v1280_v3 = vpop.eup %1279  ;;  %v461_v4 = vsub.f32 %v1540_v57, %v445_v63  ;;  %v1259_v5 = vunpack.i.h.bf16 %v1257_v0  ;;  %v1258_v6 = vunpack.i.l.bf16 %v1257_v0  ;;  %528 = vadd.xlane.f32.xlu1 %v527_v1  ;;  %501 = vadd.xlane.f32.xlu0 %v500_v2  ;;  %1291 = vpow2.f32 %v490_v61  ;;  %v844_v63 = vld [vmem:[%s1693_s4] sm:$0xff] }
 0x275   :  { %1293 = vpow2.f32 %v476_v62  ;;  %v524_v9 = vsel %vm397_vm3, %v1280_v3, 0.0 }
 0x276   :  { %v1282_v52 = vpop.eup %1281  ;;  %v492_v59 = vmul.f32 1.442695, %v461_v4  ;;  %v1225_v7 = vpack.c.bf16 %v1259_v5, %v1258_v6 }
 0x277   :  { %v1262_v8 = vpop.permute.xlu1 %1261  ;;  %v509_v10 = vsel %vm397_vm3, %v1282_v52, 0.0  ;;  %v1284_v13 = vpop.eup %1283 }
 0x278   :  { %v1264_v11 = vunpack.i.h.bf16 %v1262_v8  ;;  %v1263_v12 = vunpack.i.l.bf16 %v1262_v8  ;;  %525 = vadd.xlane.f32.xlu1 %v524_v9  ;;  %510 = vadd.xlane.f32.xlu0 %v509_v10  ;;  %1295 = vpow2.f32 %v492_v59  ;;  %v506_v16 = vsel %vm397_vm3, %v1284_v13, 0.0 }
 0x279   :  { %1226 = vmatprep.subr.bf16.mxu1 %v1225_v7 }
 0x27a   :  { %v1286_v57 = vpop.eup %1285  ;;  %v1229_v14 = vpack.c.bf16 %v1264_v11, %v1263_v12  ;;  %1228 = vmatpush3.bf16.msra.mxu1 %v1225_v7  ;;  %v846_v12 = vld [vmem:[%s1693_s4 + $0x10] sm:$0xff] }
 0x27b   :  { %v533_v15 = vsel %vm397_vm3, %v1286_v57, 0.0  ;;  %v1288_v17 = vpop.eup %1287  ;;  %1234 = vmatprep.subr.bf16.mxu1 %v1233_v29 }
 0x27c   :  { %534 = vadd.xlane.f32.xlu1 %v533_v15  ;;  %1230 = vmatprep.subr.bf16.mxu0 %v1229_v14  ;;  %v1290_v18 = vpop.eup %1289  ;;  %v530_v19 = vsel %vm397_vm3, %v1288_v17, 0.0 }
 0x27d   :  { %507 = vadd.xlane.f32.xlu0 %v506_v16  ;;  %1155 = vmatmul.mubr.msk.f32.vlgmr.msra.gmra.mrb[10].mxu1 %vm397_vm3, %v1568_v20  ;;  %v512_v22 = vsel %vm397_vm3, %v1290_v18, 0.0 }
 0x27e   :  { %1157 = vmatprep.mubr.msk.f32.mxu1 %vm397_vm3, %v1276_v58  ;;  %1232 = vmatpush3.bf16.msra.mxu0 %v1229_v14  ;;  %v1292_v21 = vpop.eup %1291 }
 0x27f   :  { %v1294_v23 = vpop.eup %1293  ;;  %v536_v20 = vsel %vm397_vm3, %v1292_v21, 0.0  ;;  %1236 = vmatpush3.bf16.msra.mxu1 %v1233_v29  ;;  %v848_v29 = vld [vmem:[%s1693_s4 + $0x20] sm:$0xff] }
 0x280   :  { %531 = vadd.xlane.f32.xlu1 %v530_v19  ;;  %v515_v25 = vsel %vm397_vm3, %v1294_v23, 0.0  ;;  %1238 = vmatprep.subr.bf16.mxu1 %v1237_v32 }
 0x281   :  { %1171 = vmatmul.mubr.msk.f32.vlgmr.msra.gmra.mrb[10].mxu0 %vm397_vm3, %v1578_v36  ;;  %513 = vadd.xlane.f32.xlu0 %v512_v22  ;;  %v888_v36 = vld [vmem:[%s1694_s5 + $0x30] sm:$0xff] }
 0x282   :  { %1158 = vmatmul.mubr.msk.f32.gmra.mrb[12].mxu1 %vm397_vm3, %v1580_v37  ;;  %1173 = vmatprep.mubr.msk.f32.mxu0 %vm397_vm3, %v1280_v3  ;;  %v1296_v24 = vpop.eup %1295  ;;  %v889_v37 = vld [vmem:[%s1694_s5 + $0x38] sm:$0xff] }
 0x283   :  { %1160 = vmatprep.mubr.msk.f32.mxu1 %vm397_vm3, %v1284_v13  ;;  %v539_v26 = vsel %vm397_vm3, %v1296_v24, 0.0  ;;  %1240 = vmatpush3.bf16.msra.mxu1 %v1237_v32  ;;  %v1245_v38 = vpack.c.bf16 %v889_v37, %v888_v36  ;;  %v849_v37 = vld [vmem:[%s1693_s4 + $0x28] sm:$0xff] }
 0x284   :  { %537 = vadd.xlane.f32.xlu1 %v536_v20  ;;  %1242 = vmatprep.subr.bf16.mxu1 %v1241_v35 }
 0x285   :  { %1174 = vmatmul.mubr.msk.f32.gmra.mrb[12].mxu0 %vm397_vm3, %v1278_v60  ;;  %516 = vadd.xlane.f32.xlu0 %v515_v25 }
 0x286   :  { %1161 = vmatmul.mubr.msk.f32.gmra.mrb[14].mxu1 %vm397_vm3, %v1282_v52  ;;  %1176 = vmatprep.mubr.msk.f32.mxu0 %vm397_vm3, %v1288_v17 }
 0x287   :  { %1163 = vmatprep.mubr.msk.f32.mxu1 %vm397_vm3, %v1290_v18  ;;  %1244 = vmatpush3.bf16.msra.mxu1 %v1241_v35  ;;  %v847_v18 = vld [vmem:[%s1693_s4 + $0x18] sm:$0xff] }
 0x288   :  { %540 = vadd.xlane.f32.xlu1 %v539_v26  ;;  %1246 = vmatprep.subr.bf16.mxu1 %v1245_v38 }
 0x289   :  { %1177 = vmatmul.mubr.msk.f32.gmra.mrb[14].mxu0 %vm397_vm3, %v1286_v57 }
 0x28a   :  { %1164 = vmatmul.mubr.msk.f32.gmra.mrb[16].mxu1 %vm397_vm3, %v1294_v23  ;;  %1179 = vmatprep.mubr.msk.f32.mxu0 %vm397_vm3, %v1292_v21 }
 0x28b   :  { %1248 = vmatpush3.bf16.msra.mxu1 %v1245_v38 }
 0x28d   :  { %1180 = vmatmul.mubr.msk.f32.gmra.mrb[16].mxu0 %vm397_vm3, %v1296_v24 }
 0x2f1   :  { %v499_v39 = vpop.xlane.xlu0 %498 }
 0x2f2   :  { %1297 = vrcp.f32 %v499_v39 }
 0x2f5   :  { %v496_v40 = vpop.xlane.xlu1 %495 }
 0x2f6   :  { %1299 = vrcp.f32 %v496_v40 }
 0x2f9   :  { %v505_v41 = vpop.xlane.xlu0 %504  ;;  %v523_v42 = vpop.xlane.xlu1 %522 }
 0x2fa   :  { %1301 = vrcp.f32 %v505_v41 }
 0x2fb   :  { %1303 = vrcp.f32 %v523_v42 }
 0x2fc   :  { %v1298_v56 = vpop.eup %1297 }
 0x2fd   :  { %v520_v43 = vpop.xlane.xlu0 %519 }
 0x2fe   :  { %1305 = vrcp.f32 %v520_v43 }
 0x300   :  { %v1300_v55 = vpop.eup %1299 }
 0x301   :  { %v529_v44 = vpop.xlane.xlu1 %528  ;;  %v502_v45 = vpop.xlane.xlu0 %501 }
 0x302   :  { %1307 = vrcp.f32 %v502_v45 }
 0x303   :  { %1309 = vrcp.f32 %v529_v44 }
 0x304   :  { %v1302_v1 = vpop.eup %1301 }
 0x305   :  { %v526_v46 = vpop.xlane.xlu1 %525  ;;  %v511_v47 = vpop.xlane.xlu0 %510 }
 0x306   :  { %1311 = vrcp.f32 %v526_v46  ;;  %v1304_v3 = vpop.eup %1303 }
 0x307   :  { %1313 = vrcp.f32 %v511_v47 }
 0x308   :  { %v1306_v52 = vpop.eup %1305 }
 0x309   :  { %v535_v48 = vpop.xlane.xlu1 %534 }
 0x30a   :  { %v508_v49 = vpop.xlane.xlu0 %507 }
 0x30b   :  { %1315 = vrcp.f32 %v508_v49 }
 0x30c   :  { %1317 = vrcp.f32 %v535_v48  ;;  %v1308_v9 = vpop.eup %1307 }
 0x30d   :  { %v532_v50 = vpop.xlane.xlu1 %531  ;;  %v1310_v57 = vpop.eup %1309 }
 0x30e   :  { %v514_v53 = vpop.xlane.xlu0 %513  ;;  %1319 = vrcp.f32 %v532_v50  ;;  %v850_v50 = vld [vmem:[%s1693_s4 + $0x30] sm:$0xff] }
 0x30f   :  { %1321 = vrcp.f32 %v514_v53 }
 0x310   :  { %v1312_v16 = vpop.eup %1311 }
 0x311   :  { %v538_v54 = vpop.xlane.xlu1 %537  ;;  %v1314_v22 = vpop.eup %1313 }
 0x312   :  { %v517_v60 = vpop.xlane.xlu0 %516 }
 0x313   :  { %1323 = vrcp.f32 %v517_v60  ;;  %v851_v60 = vld [vmem:[%s1693_s4 + $0x38] sm:$0xff] }
 0x314   :  { %1325 = vrcp.f32 %v538_v54 }
 0x315   :  { %v541_v4 = vpop.xlane.xlu1 %540  ;;  %v1316_v25 = vpop.eup %1315 }
 0x316   :  { %1327 = vrcp.f32 %v541_v4  ;;  %v1318_v31 = vpop.eup %1317 }
 0x318   :  { %v1320_v36 = vpop.eup %1319 }
 0x319   :  { %v1322_v40 = vpop.eup %1321 }
 0x31d   :  { %v1324_v45 = vpop.eup %1323 }
 0x350   :  { %v1156_v58 = vpop.f32.mrb[10].mxu1 }
 0x351   :  { %v829_v61 = vmul.f32 %v1298_v56, %v1156_v58  ;;  %v638_v62 = vpop.f32.mrb[11].mxu1 }
 0x352   :  { %v828_v0 = vmul.f32 %v1300_v55, %v638_v62  ;;  %v1326_v55 = vpop.eup %1325 }
 0x353   :  { %v853_v2 = vmul.f32 %v845_v51, %v829_v61 }
 0x354   :  { %v852_v5 = vmul.f32 %v844_v63, %v828_v0  ;;  %v1172_v6 = vpop.f32.mrb[10].mxu0  ;;  %v1328_v0 = vpop.eup %1327 }
 0x355   :  { %v1159_v59 = vpop.f32.mrb[12].mxu1  ;;  %v837_v7 = vmul.f32 %v1304_v3, %v1172_v6  ;;  %v773_v8 = vpop.f32.mrb[11].mxu0 }
 0x356   :  { %v868_v10 = vadd.f32 %v853_v2, %v852_v5  ;;  %v648_v11 = vpop.f32.mrb[13].mxu1  ;;  %v836_v13 = vmul.f32 %v1306_v52, %v773_v8  ;;  %v831_v14 = vmul.f32 %v1302_v1, %v1159_v59 }
 0x357   :  { %v861_v15 = vmul.f32 %v845_v51, %v837_v7  ;;  %v830_v17 = vmul.f32 %v1308_v9, %v648_v11 }
 0x358   :  { %v860_v19 = vmul.f32 %v844_v63, %v836_v13  ;;  %v1175_v21 = vpop.f32.mrb[12].mxu0  ;;  %v855_v32 = vmul.f32 %v847_v18, %v831_v14 }
 0x359   :  { %v854_v23 = vmul.f32 %v846_v12, %v830_v17  ;;  %v1162_v20 = vpop.f32.mrb[14].mxu1  ;;  %v783_v24 = vpop.f32.mrb[13].mxu0  ;;  %v839_v27 = vmul.f32 %v1310_v57, %v1175_v21  ;;  %v1037_v57 = vld [vmem:[%s1695_s6] ss:$0 sm:$0xff] }
 0x35a   :  { %v869_v26 = vadd.f32 %v861_v15, %v860_v19  ;;  %v658_v28 = vpop.f32.mrb[15].mxu1  ;;  %v838_v30 = vmul.f32 %v1312_v16, %v783_v24  ;;  %v833_v34 = vmul.f32 %v1314_v22, %v1162_v20 }
 0x35b   :  { %v870_v33 = vadd.f32 %v868_v10, %v854_v23  ;;  %v832_v35 = vmul.f32 %v1316_v25, %v658_v28  ;;  %v863_v46 = vmul.f32 %v847_v18, %v839_v27 }
 0x35c   :  { %v862_v38 = vmul.f32 %v846_v12, %v838_v30  ;;  %v1178_v39 = vpop.f32.mrb[14].mxu0  ;;  %v857_v54 = vmul.f32 %v849_v37, %v833_v34 }
 0x35d   :  { %v856_v41 = vmul.f32 %v848_v29, %v832_v35  ;;  %v872_v42 = vadd.f32 %v870_v33, %v855_v32  ;;  %v1165_v43 = vpop.f32.mrb[16].mxu1  ;;  %v793_v44 = vpop.f32.mrb[15].mxu0  ;;  %v841_v48 = vmul.f32 %v1318_v31, %v1178_v39 }
 0x35e   :  { %v871_v47 = vadd.f32 %v869_v26, %v862_v38  ;;  %v668_v49 = vpop.f32.mrb[17].mxu1  ;;  %v840_v53 = vmul.f32 %v1320_v36, %v793_v44  ;;  %v835_v58 = vmul.f32 %v1324_v45, %v1165_v43 }
 0x35f   :  { %v874_v56 = vadd.f32 %v872_v42, %v856_v41  ;;  %v834_v51 = vmul.f32 %v1322_v40, %v668_v49  ;;  %v865_v4 = vmul.f32 %v849_v37, %v841_v48 }
 0x360   :  { %v864_v61 = vmul.f32 %v848_v29, %v840_v53  ;;  %v873_v62 = vadd.f32 %v871_v47, %v863_v46  ;;  %v1181_v63 = vpop.f32.mrb[16].mxu0  ;;  %v859_v59 = vmul.f32 %v851_v60, %v835_v58 }
 0x361   :  { %v858_v1 = vmul.f32 %v850_v50, %v834_v51  ;;  %v876_v2 = vadd.f32 %v874_v56, %v857_v54  ;;  %v803_v3 = vpop.f32.mrb[17].mxu0  ;;  %v843_v6 = vmul.f32 %v1328_v0, %v1181_v63 }
 0x362   :  { %v875_v5 = vadd.f32 %v873_v62, %v864_v61  ;;  %v842_v52 = vmul.f32 %v1326_v55, %v803_v3 }
 0x363   :  { %v878_v7 = vadd.f32 %v876_v2, %v858_v1  ;;  %v867_v11 = vmul.f32 %v851_v60, %v843_v6 }
 0x364   :  { %v866_v8 = vmul.f32 %v850_v50, %v842_v52  ;;  %v877_v9 = vadd.f32 %v875_v5, %v865_v4 }
 0x365   :  { %v880_v10 = vadd.f32 %v878_v7, %v859_v59 }
 0x366   :  { %v879_v12 = vadd.f32 %v877_v9, %v866_v8 }
 0x367   :  { %1198 = vmatprep.mubr.msk.f32.mxu1 %vm150_vm1, %v880_v10 }
 0x368   :  { %v881_v13 = vadd.f32 %v879_v12, %v867_v11 }
 0x36a   :  { %1199 = vmatmul.mubr.msk.f32.vlgmr.msra.gmra.mrb[18].mxu1 %vm150_vm1, %v881_v13 }
 0x43d   :  { %v1200_v14 = vpop.f32.mrb[18].mxu1 }
 0x43e   :  { %v975_v15 = vadd.f32 %v1200_v14, %v1037_v57  ;;  %v969_v17 = vpop.f32.mrb[19].mxu1 }
 0x43f   :  { %v970_v16 = vadd.f32 %v1037_v57, %v969_v17 }
 0x440   :  { %979 = vst.msk [vmem:[#allocation2 + $0x8] sm:$0xff] %vm150_vm1, %v975_v15 }
 0x441   :  { %978 = vst.msk [vmem:[#allocation2] sm:$0xff] %vm150_vm1, %v970_v16 }
 0x442   :  { %1340 = shalt.err (!%p1337_p4)
}
 0x443   :  { %s1341_s21 = scalar_lea.hbm %s1696_s7, 256 }
 0x444   :  { %p1342_p5 = scmp.ne.s32.totalorder %s1696_s7, %s1341_s21  ;;  %p1345_p6 = scmp.lt.u32.totalorder %s1341_s21, %s1696_s7 }
 0x446   :  { %p1347_p7 = pnand %p1345_p6, %p1342_p5 }
 0x448   :  { %1350 = shalt.err (!%p1347_p7)
}
 0x449   :  { %s1355_s24 = smov 128   ;;  %s1356_s25 = smov 8  }
 0x44a   :  { %991 = dma.vmem_to_hbm [thread:$0]  %s986_s18, 256, %s1696_s7, [#allocation3], %s1355_s24, %s1355_s24, %s1356_s25  }
 0x44b   :  { %1351 = dma.done.wait [#allocation3], 256  }
 0x44c   :  { %1352 = vsyncadd [#allocation3], 4294967040 }
 0x44d   :  { %995 = vsyncpa [#allocation3], 1 }

</bundles_post_ra>
